<compile_context>
chip_gen: v7x
topology: tpu7x:2x2x1
jax: 0.10.0
libtpu: 0.0.40
codegen_flags: <defaults>
</compile_context>

<pallas_src>
import functools
import math

import jax
import jax.numpy as jnp
from jax.experimental import pallas as pl
from jax.experimental.pallas import tpu as pltpu


def _round_up(x, m):
    return ((x + m - 1) // m) * m


def _ffn_kernel(seed_ref, x_ref, w1_ref, b1_ref, w2_ref, b2_ref, o_ref, *acc,
                dropout_rate, acc_in_out):
    """One (row-tile i, d_ff-tile j) step of w2 @ dropout(relu(w1 @ x + b1)) + b2."""
    j = pl.program_id(1)
    acc_ref = o_ref if acc_in_out else acc[0]

    @pl.when(j == 0)
    def _():
        if acc_in_out:
            # f32 output: accumulate straight into o_ref (saves a VMEM scratch
            # tile and the epilogue copy) -> initialize with broadcast b2.
            acc_ref[...] = jnp.broadcast_to(
                b2_ref[...].astype(acc_ref.dtype), acc_ref.shape)
        else:
            acc_ref[...] = jnp.zeros_like(acc_ref)

    # First GEMM (MXU): (tr, d_model) x (d_model, tf) -> (tr, tf), f32 accum.
    h = jnp.dot(x_ref[...], w1_ref[...], preferred_element_type=jnp.float32)
    h = jnp.maximum(h + b1_ref[...].astype(jnp.float32), 0.0)

    if dropout_rate > 0.0:
        # Training-mode inverted dropout from a stateless counter-based hash of
        # the global (row, col) element index + seed.  Pure integer VPU ops, so
        # it lowers on TPU and in interpret mode (pltpu.prng_* does not), and
        # the mask is independent of the tiling choice.
        # TODO(synk): not bit-identical to torch.nn.Dropout's RNG stream.
        tr, tf = h.shape
        i = pl.program_id(0)
        row = (jax.lax.broadcasted_iota(jnp.uint32, h.shape, 0)
               + (i * tr).astype(jnp.uint32))
        col = (jax.lax.broadcasted_iota(jnp.uint32, h.shape, 1)
               + (j * tf).astype(jnp.uint32))
        seed_u = seed_ref[0].astype(jnp.uint32)
        v = ((row * jnp.uint32(0x9E3779B1))
             ^ (col * jnp.uint32(0x85EBCA77))
             ^ (seed_u * jnp.uint32(0xC2B2AE3D)))
        v = v ^ (v >> 16)
        v = v * jnp.uint32(0x7FEB352D)
        v = v ^ (v >> 15)
        v = v * jnp.uint32(0x846CA68B)
        v = v ^ (v >> 16)
        # keep iff v < (1-p)*2^32 (saturated); residual bias ~2^-32, negligible.
        keep_thresh = jnp.uint32(
            min(int((1.0 - dropout_rate) * 4294967296.0), 4294967295))
        h = jnp.where(v < keep_thresh,
                      h * jnp.float32(1.0 / (1.0 - dropout_rate)),
                      jnp.float32(0.0))

    # Second GEMM (MXU): accumulate partial products over d_ff tiles.  Note
    # h is downcast to the weight/compute dtype first (numerics-visible when
    # compute_dtype=bf16; f32 accumulation is preserved).
    acc_ref[...] += jnp.dot(h.astype(w2_ref.dtype), w2_ref[...],
                            preferred_element_type=jnp.float32
                            ).astype(acc_ref.dtype)

    if not acc_in_out:
        @pl.when(j == pl.num_programs(1) - 1)
        def _():
            o_ref[...] = (acc_ref[...] + b2_ref[...].astype(jnp.float32)
                          ).astype(o_ref.dtype)


def _vmem_budget_bytes():
    """Per-generation usable VMEM limit (128 MiB parts -> ~96 MiB, 64 MiB -> ~48 MiB)."""
    cap = None
    try:
        cap = int(pltpu.get_tpu_info().vmem_capacity_bytes)
    except Exception:
        cap = None
    if not cap:
        cap = 64 * 1024 * 1024          # conservative (v7x-sized) fallback
    return min((cap * 3) // 4, 96 * 1024 * 1024)


def positionwise_feed_forward(x, w1, b1, w2, b2, *, dropout_rate=0.0, seed=0,
                              compute_dtype=None):
    """Forward of PositionwiseFeedForward.

    x:  (..., d_model)
    w1: (d_model, d_ff)   b1: (d_ff,)
    w2: (d_ff, d_model)   b2: (d_model,)
    dropout_rate=0.0 reproduces eval-mode (identity dropout) exactly.
    compute_dtype=jnp.bfloat16 feeds the MXU bf16 (f32 accumulation) -- faster,
    numerics-visible.
    """
    d_model = x.shape[-1]
    d_ff = w1.shape[1]
    assert w1.shape == (d_model, d_ff)
    assert w2.shape == (d_ff, d_model)
    assert b1.shape == (d_ff,) and b2.shape == (d_model,)

    out_dtype = jnp.dtype(x.dtype)
    c_dtype = jnp.dtype(compute_dtype) if compute_dtype is not None else out_dtype
    c_size = c_dtype.itemsize
    o_size = out_dtype.itemsize

    lead = x.shape[:-1]
    rows = math.prod(lead) if lead else 1
    x2d = x.reshape(rows, d_model).astype(c_dtype)
    w1c = w1.astype(c_dtype)
    w2c = w2.astype(c_dtype)

    # Lane-dense padding: last dims always multiples of 128 so vector stores
    # are unmasked and MXU tiles are full.  Zero padding is provably inert.
    d_model_p = _round_up(d_model, 128)
    d_ff_128 = _round_up(d_ff, 128)

    vmem_budget = _vmem_budget_bytes()
    big_vmem = vmem_budget >= 80 * 1024 * 1024
    row_tile_cap = 512 if big_vmem else 256
    ff_tile_cap = 1024 if big_vmem else 512

    # Row tile: large (amortizes ~0.35us/grid-step overhead & weight traffic),
    # aligned to the dtype's sublane packing.  Rows are independent, so the
    # zero-padded tail rows cannot pollute real outputs.
    sublane = max(8, 32 // c_size)
    tr = min(_round_up(row_tile_cap, sublane), _round_up(rows, sublane))
    # Megacore (v7x, 2 TCs): keep >= 2 tiles on the "parallel" row axis.
    if rows > sublane and _round_up(rows, tr) // tr < 2:
        tr = _round_up((rows + 1) // 2, sublane)
    rows_p = _round_up(rows, tr)

    acc_in_out = out_dtype == jnp.dtype(jnp.float32)

    def fits(tf):
        w_bytes = 2 * 2 * d_model_p * tf * c_size     # W1 + W2, double-buffered
        b_bytes = 2 * (tf + d_model_p) * 4
        x_bytes = 2 * tr * d_model_p * c_size
        o_bytes = 2 * tr * d_model_p * o_size
        h_bytes = tr * tf * 4                         # relu(xW1+b1) intermediate
        a_bytes = 0 if acc_in_out else tr * d_model_p * 4
        return (w_bytes + b_bytes + x_bytes + o_bytes + h_bytes + a_bytes
                <= int(vmem_budget * 0.85))

    # d_ff tile: if the full (padded) weights fit VMEM, use tf == d_ff so the
    # W1/W2 block index is constant across the grid -> weights DMA'd from HBM
    # exactly once (no re-streaming per row tile).  Otherwise tile d_ff.
    if fits(d_ff_128):
        tf = d_ff_128
    else:
        tf = min(_round_up(ff_tile_cap, 128), d_ff_128)
        while tf > 128 and not fits(tf):
            tf = max(128, _round_up(tf // 2, 128))
    d_ff_p = _round_up(d_ff, tf)

    # Zero-pad (no-op where widths are 0).
    x2d = jnp.pad(x2d, ((0, rows_p - rows), (0, d_model_p - d_model)))
    w1c = jnp.pad(w1c, ((0, d_model_p - d_model), (0, d_ff_p - d_ff)))
    w2c = jnp.pad(w2c, ((0, d_ff_p - d_ff), (0, d_model_p - d_model)))
    b1p = jnp.pad(b1.reshape(1, d_ff), ((0, 0), (0, d_ff_p - d_ff)))
    b2p = jnp.pad(b2.reshape(1, d_model), ((0, 0), (0, d_model_p - d_model)))
    seed_arr = jnp.asarray([seed], dtype=jnp.int32)

    grid = (rows_p // tr, d_ff_p // tf)
    kernel = functools.partial(_ffn_kernel, dropout_rate=float(dropout_rate),
                               acc_in_out=acc_in_out)
    scratch_shapes = [] if acc_in_out else [pltpu.VMEM((tr, d_model_p),
                                                       jnp.float32)]

    out2d = pl.pallas_call(
        kernel,
        out_shape=jax.ShapeDtypeStruct((rows_p, d_model_p), out_dtype),
        grid_spec=pltpu.PrefetchScalarGridSpec(
            num_scalar_prefetch=1,                        # dropout seed -> SMEM
            grid=grid,
            in_specs=[
                pl.BlockSpec((tr, d_model_p), lambda i, j, s: (i, 0)),  # x rows
                pl.BlockSpec((d_model_p, tf), lambda i, j, s: (0, j)),  # W1 cols
                pl.BlockSpec((1, tf),         lambda i, j, s: (0, j)),  # b1
                pl.BlockSpec((tf, d_model_p), lambda i, j, s: (j, 0)),  # W2 rows
                pl.BlockSpec((1, d_model_p),  lambda i, j, s: (0, 0)),  # b2
            ],
            out_specs=pl.BlockSpec((tr, d_model_p), lambda i, j, s: (i, 0)),
            scratch_shapes=scratch_shapes,
        ),
        compiler_params=pltpu.CompilerParams(
            # Row tiles are independent -> megacore-shardable; d_ff is the
            # K-reduction of the second GEMM -> arbitrary.
            dimension_semantics=("parallel", "arbitrary"),
            vmem_limit_bytes=int(vmem_budget),
        ),
        cost_estimate=pl.CostEstimate(
            flops=4 * rows * d_model * d_ff,
            transcendentals=0,
            bytes_accessed=int(rows * d_model * (c_size + o_size)
                               + 2 * d_model * d_ff * c_size
                               + (d_ff + d_model) * 4),
        ),
    )(seed_arr, x2d, w1c, b1p, w2c, b2p)

    out2d = out2d[:rows, :d_model]
    return out2d.reshape(*lead, d_model)


if __name__ == "__main__":
    # Small, lane-dense shapes: batch=2, seq=8, d_model=128, d_ff=256.
    batch, seq, d_model, d_ff = 2, 8, 128, 256

    key = jax.random.PRNGKey(0)
    kx, kw1, kb1, kw2, kb2 = jax.random.split(key, 5)
    x = jax.random.normal(kx, (batch, seq, d_model), dtype=jnp.float32)

    # Deterministic weights (PyTorch nn.Linear-style uniform init bounds).
    lim1 = 1.0 / math.sqrt(d_model)
    lim2 = 1.0 / math.sqrt(d_ff)
    w1 = jax.random.uniform(kw1, (d_model, d_ff), jnp.float32, -lim1, lim1)
    b1 = jax.random.uniform(kb1, (d_ff,), jnp.float32, -lim1, lim1)
    w2 = jax.random.uniform(kw2, (d_ff, d_model), jnp.float32, -lim2, lim2)
    b2 = jax.random.uniform(kb2, (d_model,), jnp.float32, -lim2, lim2)

    # Eval-mode forward (dropout = identity) -> exact reference check.
    out = positionwise_feed_forward(x, w1, b1, w2, b2, dropout_rate=0.0)
    out = jax.block_until_ready(out)

    h_ref = jnp.maximum(jnp.einsum("bsd,df->bsf", x, w1) + b1, 0.0)
    ref = jnp.einsum("bsf,fd->bsd", h_ref, w2) + b2
    assert out.shape == ref.shape
    assert jnp.allclose(out, ref, atol=2e-2, rtol=2e-2), "mismatch vs reference"

    # bf16-MXU compute path (numerics-visible; f32 accumulation) -> loose check.
    out_bf16 = positionwise_feed_forward(x, w1, b1, w2, b2, dropout_rate=0.0,
                                         compute_dtype=jnp.bfloat16)
    out_bf16 = jax.block_until_ready(out_bf16)
    assert out_bf16.shape == ref.shape
    assert jnp.allclose(out_bf16, ref, atol=1e-1, rtol=1e-1), "bf16 path mismatch"

    # Training-mode dropout smoke test (stochastic mask -> shape/finite checks).
    out_drop = positionwise_feed_forward(x, w1, b1, w2, b2,
                                         dropout_rate=0.1, seed=42)
    out_drop = jax.block_until_ready(out_drop)
    assert out_drop.shape == out.shape
    assert bool(jnp.all(jnp.isfinite(out_drop)))

    print("KERNEL_OK")
</pallas_src>

<mosaic_0001>
module attributes {stable_mosaic.version = 11 : i64} {
  func.func @_ffn_kernel(%arg0: i32, %arg1: i32, %arg2: memref<1xi32, #tpu.memory_space<smem>>, %arg3: memref<8x128xf32, #tpu.memory_space<vmem>>, %arg4: memref<128x256xf32, #tpu.memory_space<vmem>>, %arg5: memref<1x256xf32, #tpu.memory_space<vmem>>, %arg6: memref<256x128xf32, #tpu.memory_space<vmem>>, %arg7: memref<1x128xf32, #tpu.memory_space<vmem>>, %arg8: memref<8x128xf32, #tpu.memory_space<vmem>>) attributes {dimension_semantics = [#tpu.dimension_semantics<parallel>, #tpu.dimension_semantics<arbitrary>], iteration_bounds = array<i64: 2, 1>, scalar_prefetch = 1 : i64, scratch_operands = 0 : i64, tpu.core_type = #tpu.core_type<tc>, window_params = [{transform_indices = @transform_0, window_bounds = array<i64: 8, 128>}, {transform_indices = @transform_1, window_bounds = array<i64: 128, 256>}, {transform_indices = @transform_2, window_bounds = array<i64: 1, 256>}, {transform_indices = @transform_3, window_bounds = array<i64: 256, 128>}, {pipeline_mode = #tpu.pipeline_mode<synchronous>, transform_indices = @transform_4, window_bounds = array<i64: 1, 128>}, {transform_indices = @transform_5, window_bounds = array<i64: 8, 128>}]} {
    %c0_i32 = arith.constant 0 : i32
    %0 = arith.cmpi eq, %arg1, %c0_i32 : i32
    %1 = arith.extui %0 : i1 to i32
    %c0_i32_0 = arith.constant 0 : i32
    %2 = arith.cmpi ne, %1, %c0_i32_0 : i32
    scf.if %2 {
      %c0_14 = arith.constant 0 : index
      %c0_15 = arith.constant 0 : index
      %16 = vector.load %arg7[%c0_14, %c0_15] : memref<1x128xf32, #tpu.memory_space<vmem>>, vector<1x128xf32>
      %17 = vector.shape_cast %16 : vector<1x128xf32> to vector<1x128xf32>
      %18 = vector.broadcast %17 : vector<1x128xf32> to vector<8x128xf32>
      %c0_16 = arith.constant 0 : index
      %c0_17 = arith.constant 0 : index
      %19 = vector.load %arg8[%c0_16, %c0_17] : memref<8x128xf32, #tpu.memory_space<vmem>>, vector<8x128xf32>
      tpu.vector_store %arg8[%c0_16, %c0_17], %18 {strides = array<i32>} : memref<8x128xf32, #tpu.memory_space<vmem>>, vector<8x128xf32>,
    } else {
    }
    %c0 = arith.constant 0 : index
    %c0_1 = arith.constant 0 : index
    %3 = vector.load %arg3[%c0, %c0_1] : memref<8x128xf32, #tpu.memory_space<vmem>>, vector<8x128xf32>
    %c0_2 = arith.constant 0 : index
    %c0_3 = arith.constant 0 : index
    %4 = vector.load %arg4[%c0_2, %c0_3] : memref<128x256xf32, #tpu.memory_space<vmem>>, vector<128x256xf32>
    %cst = arith.constant dense<0.000000e+00> : vector<8x256xf32>
    %5 = tpu.matmul %3, %4, %cst {dimension_numbers = #tpu.dot_dimension_numbers<[1], [0], [0], [1], [0, 0, 1, 1], [], []>} : vector<8x128xf32>, vector<128x256xf32>, vector<8x256xf32> -> vector<8x256xf32>
    %c0_4 = arith.constant 0 : index
    %c0_5 = arith.constant 0 : index
    %6 = vector.load %arg5[%c0_4, %c0_5] : memref<1x256xf32, #tpu.memory_space<vmem>>, vector<1x256xf32>
    %7 = vector.broadcast %6 : vector<1x256xf32> to vector<8x256xf32>
    %8 = arith.addf %5, %7 : vector<8x256xf32>
    %cst_6 = arith.constant 0.000000e+00 : f32
    %9 = vector.broadcast %cst_6 : f32 to vector<8x256xf32>
    %10 = arith.maximumf %8, %9 : vector<8x256xf32>
    %c0_7 = arith.constant 0 : index
    %c0_8 = arith.constant 0 : index
    %11 = vector.load %arg8[%c0_7, %c0_8] : memref<8x128xf32, #tpu.memory_space<vmem>>, vector<8x128xf32>
    %c0_9 = arith.constant 0 : index
    %c0_10 = arith.constant 0 : index
    %12 = vector.load %arg6[%c0_9, %c0_10] : memref<256x128xf32, #tpu.memory_space<vmem>>, vector<256x128xf32>
    %cst_11 = arith.constant dense<0.000000e+00> : vector<8x128xf32>
    %13 = tpu.matmul %10, %12, %cst_11 {dimension_numbers = #tpu.dot_dimension_numbers<[1], [0], [0], [1], [0, 0, 1, 1], [], []>} : vector<8x256xf32>, vector<256x128xf32>, vector<8x128xf32> -> vector<8x128xf32>
    %14 = arith.addf %11, %13 : vector<8x128xf32>
    %c0_12 = arith.constant 0 : index
    %c0_13 = arith.constant 0 : index
    %15 = vector.load %arg8[%c0_12, %c0_13] : memref<8x128xf32, #tpu.memory_space<vmem>>, vector<8x128xf32>
    tpu.vector_store %arg8[%c0_12, %c0_13], %14 {strides = array<i32>} : memref<8x128xf32, #tpu.memory_space<vmem>>, vector<8x128xf32>,
    return
  }
  func.func @transform_0(%arg0: i32, %arg1: i32, %arg2: memref<1xi32, #tpu.memory_space<smem>>) -> (i32, i32) {
    %c0_i32 = arith.constant 0 : i32
    %c0_i32_0 = arith.constant 0 : i32
    return %arg0, %c0_i32 : i32, i32
  }
  func.func @transform_1(%arg0: i32, %arg1: i32, %arg2: memref<1xi32, #tpu.memory_space<smem>>) -> (i32, i32) {
    %c0_i32 = arith.constant 0 : i32
    %c0_i32_0 = arith.constant 0 : i32
    return %c0_i32, %arg1 : i32, i32
  }
  func.func @transform_2(%arg0: i32, %arg1: i32, %arg2: memref<1xi32, #tpu.memory_space<smem>>) -> (i32, i32) {
    %c0_i32 = arith.constant 0 : i32
    %c0_i32_0 = arith.constant 0 : i32
    return %c0_i32, %arg1 : i32, i32
  }
  func.func @transform_3(%arg0: i32, %arg1: i32, %arg2: memref<1xi32, #tpu.memory_space<smem>>) -> (i32, i32) {
    %c0_i32 = arith.constant 0 : i32
    %c0_i32_0 = arith.constant 0 : i32
    return %arg1, %c0_i32 : i32, i32
  }
  func.func @transform_4(%arg0: i32, %arg1: i32, %arg2: memref<1xi32, #tpu.memory_space<smem>>) -> (i32, i32) {
    %c0_i32 = arith.constant 0 : i32
    %c0_i32_0 = arith.constant 0 : i32
    %c0_i32_1 = arith.constant 0 : i32
    return %c0_i32, %c0_i32_0 : i32, i32
  }
  func.func @transform_5(%arg0: i32, %arg1: i32, %arg2: memref<1xi32, #tpu.memory_space<smem>>) -> (i32, i32) {
    %c0_i32 = arith.constant 0 : i32
    %c0_i32_0 = arith.constant 0 : i32
    return %arg0, %c0_i32 : i32, i32
  }
}

</mosaic_0001>

<bundles_post_ra>
// kernel: tpu_custom_call.1
= control target key start
LH: loop header
LB: loop body
LE: loop exit
PB: predicated region body
PF: predicated region fallthrough
CT: control target
= control target key end

     0   :  { %12 = vsyncpa [#allocation5], 0  ;;  %s1369_s0 = inlined_call_operand.<no memory space> [shape: s32[1], index: 0, kind: input, shape index: {}]   ;;  %s1370_s1 = inlined_call_operand.hbm [shape: f32[16,128], index: 1, kind: input, shape index: {}]   ;;  %s1371_s2 = inlined_call_operand.hbm [shape: f32[128,256], index: 2, kind: input, shape index: {}]   ;;  %s1372_s3 = inlined_call_operand.vmem [shape: f32[1,256], index: 3, kind: input, shape index: {}]   ;;  %s1373_s4 = inlined_call_operand.hbm [shape: f32[256,128], index: 4, kind: input, shape index: {}]   ;;  %s1374_s5 = inlined_call_operand.vmem [shape: f32[1,128], index: 5, kind: input, shape index: {}]   ;;  %s1375_s6 = inlined_call_operand.hbm [shape: f32[16,128], index: 6, kind: output, shape index: {}]  }
   0x1   :  { %14 = vsyncpa [#allocation5 + $0x1], 0 }
   0x2   :  { %15 = vsyncpa [#allocation8], 0 }
   0x3   :  { %16 = vsyncpa [#allocation6], 0 }
   0x4   :  { %18 = vsyncpa [#allocation6 + $0x1], 0  ;;  %s1106_s0 = smov 0   ;;  %s1108_s21 = smov 0  }
   0x5   :  { %s1110_s22 = smov 0   ;;  %s1112_s23 = smov 0  }
   0x6   :  { %s1114_s24 = smov 0   ;;  %s1116_s25 = smov 0  }
   0x7 LB: > { %s682_s26 = sadd.s32 4294967295, %s1060_s25   ;;  %s683_s27 = sadd.s32 4294967294, %s1060_s25   ;;  %s1060_s25 = sphi %s1116_s25, %s24_s25   ;;  %s1056_s24 = sphi %s1114_s24, %s1397_s24   ;;  %s1052_s23 = sphi %s1112_s23, %s1396_s23   ;;  %s1048_s22 = sphi %s1110_s22, %s1395_s22   ;;  %s1044_s21 = sphi %s1108_s21, %s1394_s21   ;;  %s1040_s0 = sphi %s1106_s0, %s1393_s0  }
   0x8   : > { %p56_p0 = scmp.ne.s32.totalorder %s1044_s21, %s1040_s0  ;;  %p1140_p1 = scmp.eq.s32.totalorder %s682_s26, 0 }
   0x9   : > { %p1144_p2 = scmp.eq.s32.totalorder %s682_s26, 1  ;;  %p185_p3 = scmp.eq.s32.totalorder %s683_s27, 1 }
   0xa   : > { %s1380_s28 = scalar_select %p1140_p1, 1, 0 }
   0xb   : > { %p1150_p4 = por %p1140_p1, %p56_p0  ;;  %p684_p5 = scmp.ge.s32.totalorder %s1060_s25, 1 }
   0xc   : > { %p1155_p6 = por %p185_p3, %p56_p0  ;;  %p192_p7 = scmp.lt.s32.totalorder %s1060_s25, 3 }
   0xd   : > { %s1382_s30 = scalar_select %p1150_p4, 1, 0 }
   0xe   : > { %s1383_s7 = scalar_select %p1155_p6, 1, 0 }
   0xf   : > { %p1160_p8 = pnand %p684_p5, %p192_p7  ;;  %s1062_s9 = smov [#allocation7]  }
  0x10   : > { %s207_s10 = sshll.u32 %s1062_s9, 4  ;;  %s1063_s12 = smov [#allocation9]   ;;  %s1164_s10 = int_to_ptr.vmem [resolvable:$true] %s207_s10 }
  0x11   : > { %p812_p9 = pneg %p1160_p8  ;;  %s231_s13 = sshll.u32 %s1063_s12, 4  ;;  %s1175_s13 = int_to_ptr.vmem [resolvable:$true] %s231_s13 }
  0x12   : > { %s888_s16 = scalar_lea.hbm %s1371_s2, 4096 }
  0x13   : > { %p1171_p11 = pnand %p812_p9, %p1140_p1  ;;  %p889_p12 = scmp.ne.s32.totalorder %s1371_s2, %s888_s16 }
  0x14   : > { %p895_p5 = scmp.lt.u32.totalorder %s888_s16, %s1371_s2 }
  0x15   : > { %p890_p13 = pneg %p1171_p11 }
  0x17   : > { %p891_p0 = pnand %p890_p13, %p889_p12 }
  0x19   : > { %p892_p3 = pneg %p891_p0 }
  0x1b   : > { %p897_p7 = pnand %p895_p5, %p892_p3 }
  0x1d   : > { %900 = shalt.err (!%p897_p7)
}
  0x1e   : > { %s901_s26 = scalar_lea.vmem %s1164_s10, 4096  ;;  %p909_p1 = scmp.lt.s32.totalorder %s1164_s10, %s1164_s10 }
  0x1f   : > { %p902_p9 = scmp.ne.s32.totalorder %s1164_s10, %s901_s26  ;;  %p910_p12 = scmp.lt.s32.totalorder %s901_s26, %s901_s26 }
  0x21   : > { %p904_p10 = pnand %p902_p9, %p890_p13  ;;  %p911_p0 = por %p910_p12, %p909_p1 }
  0x23   : > { %p905_p6 = pneg %p904_p10 }
  0x25   : > { %p912_p4 = pnand %p911_p0, %p905_p6 }
  0x27   : > { %915 = shalt.err (!%p912_p4)
}
  0x28   : > { %s1064_s27 = smov 256   ;;  %s1065_s9 = smov 16  }
  0x29   : > { %815 = dma.hbm_to_vmem [thread:$0]  (!%p1171_p11), %s1371_s2, 4096, %s1164_s10, [#allocation8], %s1064_s27, %s1064_s27, %s1065_s9  }
  0x2a   : > { %s916_s17 = scalar_lea.hbm %s1373_s4, 4096 }
  0x2b   : > { %p917_p1 = scmp.ne.s32.totalorder %s1373_s4, %s916_s17  ;;  %p923_p10 = scmp.lt.u32.totalorder %s916_s17, %s1373_s4 }
  0x2d   : > { %p919_p4 = pnand %p917_p1, %p890_p13 }
  0x2f   : > { %p920_p6 = pneg %p919_p4 }
  0x31   : > { %p925_p3 = pnand %p923_p10, %p920_p6 }
  0x33   : > { %928 = shalt.err (!%p925_p3)
}
  0x34   : > { %s929_s10 = scalar_lea.vmem %s1175_s13, 4096  ;;  %p937_p12 = scmp.lt.s32.totalorder %s1175_s13, %s1175_s13 }
  0x35   : > { %p930_p5 = scmp.ne.s32.totalorder %s1175_s13, %s929_s10  ;;  %p938_p0 = scmp.lt.s32.totalorder %s929_s10, %s929_s10 }
  0x37   : > { %p932_p7 = pnand %p930_p5, %p890_p13  ;;  %p939_p1 = por %p938_p0, %p937_p12 }
  0x39   : > { %p933_p9 = pneg %p932_p7 }
  0x3b   : > { %p940_p4 = pnand %p939_p1, %p933_p9 }
  0x3d   : > { %943 = shalt.err (!%p940_p4)
}
  0x3e   : > { %s1066_s27 = smov 128   ;;  %s1067_s9 = smov 8  }
  0x3f   : > { %818 = dma.hbm_to_vmem [thread:$0]  (!%p1171_p11), %s1373_s4, 4096, %s1175_s13, [#allocation8], %s1066_s27, %s1066_s27, %s1067_s9  }
  0x40   : > { %s36_s15 = sadd.s32 1, %s1056_s24  ;;  %s43_s16 = sadd.s32 1, %s1048_s22 }
  0x41   : > { %p38_p13 = scmp.ge.s32.totalorder %s36_s15, 2  ;;  %p50_p6 = scmp.ne.s32.totalorder %s1048_s22, %s1044_s21 }
  0x42   : > { %p51_p10 = scmp.eq.s32.totalorder %s1060_s25, 0  ;;  %p829_p3 = scmp.lt.s32.totalorder %s1060_s25, 2 }
  0x43   : > { %s1399_s15 = smov (%p38_p13, %s36_s15), 0  ;;  %p1239_p7 = por %p1144_p2, %p50_p6 }
  0x44   : > { %p52_p5 = por %p51_p10, %p50_p6  ;;  %s40_s11 = ssub.s32 %s1056_s24, %s1399_s15 }
  0x45   : > { %s1386_s17 = scalar_select %p1239_p7, 1, 0 }
  0x46   : > { %s248_s18 = sand.u32 1, %s1048_s22   ;;  %p41_p9 = scmp.eq.s32.totalorder %s40_s11, 0 }
  0x47   : > { %s689_s13 = sshll.u32 %s248_s18, 3  ;;  %s690_s19 = sshll.u32 %s1056_s24, 7 }
  0x48   : > { %s1248_s20 = scalar_select %p41_p9, %s1048_s22, %s43_s16  }
  0x49   : > { %s1253_s27 = scalar_lea.hbm %s1370_s1, %s690_s19  ;;  %s252_s29 = scalar_lea.vmem [#allocation4], %s689_s13 }
  0x4a   : > { %s259_s9 = sshll.u32 %s252_s29, 4  ;;  %p1257_p2 = pnand %p829_p3, %p52_p5  ;;  %s1261_s9 = int_to_ptr.vmem [resolvable:$true] %s259_s9 }
  0x4b   : > { %s249_s14 = scalar_lea.sflag [#allocation5], %s248_s18  ;;  %s944_s16 = scalar_lea.hbm %s1253_s27, 128 }
  0x4c   : > { %p945_p11 = scmp.ne.s32.totalorder %s1253_s27, %s944_s16  ;;  %p946_p12 = pneg %p1257_p2 }
  0x4d   : > { %s949_s19 = scalar_lea.hbm %s1370_s1, 256  ;;  %p950_p4 = scmp.lt.u32.totalorder %s1253_s27, %s1370_s1 }
  0x4e   : > { %p947_p0 = pnand %p946_p12, %p945_p11  ;;  %p951_p13 = scmp.lt.u32.totalorder %s949_s19, %s944_s16 }
  0x4f   : > { %p953_p10 = scmp.lt.u32.totalorder %s944_s16, %s1253_s27 }
  0x50   : > { %p948_p1 = pneg %p947_p0  ;;  %p952_p6 = por %p951_p13, %p950_p4 }
  0x52   : > { %p954_p3 = por %p953_p10, %p952_p6 }
  0x54   : > { %p955_p5 = pnand %p954_p3, %p948_p1 }
  0x56   : > { %958 = shalt.err (!%p955_p5)
}
  0x57   : > { %s959_s18 = scalar_lea.vmem %s1261_s9, 128  ;;  %s1068_s29 = smov [#allocation4]  }
  0x58   : > { %p960_p9 = scmp.ne.s32.totalorder %s1261_s9, %s959_s18  ;;  %s964_s11 = sshll.u32 %s1068_s29, 4  ;;  %s965_s11 = int_to_ptr.vmem [resolvable:$false] %s964_s11 }
  0x59   : > { %s966_s13 = scalar_lea.vmem %s965_s11, 256  ;;  %p967_p7 = scmp.lt.s32.totalorder %s1261_s9, %s965_s11 }
  0x5a   : > { %p962_p11 = pnand %p960_p9, %p946_p12  ;;  %p968_p4 = scmp.lt.s32.totalorder %s966_s13, %s959_s18 }
  0x5c   : > { %p963_p0 = pneg %p962_p11  ;;  %p969_p13 = por %p968_p4, %p967_p7 }
  0x5e   : > { %p970_p6 = pnand %p969_p13, %p963_p0 }
  0x60   : > { %973 = shalt.err (!%p970_p6)
}
  0x61   : > { %822 = dma.hbm_to_vmem [thread:$0]  (!%p1257_p2), %s1253_s27, 128, %s1261_s9, %s249_s14  }
  0x62   : > { %268 = sbr.rel (%p1160_p8) target bundleno = 593 (0x251), region = 40  ;;  %s1291_s16 = sand.u32 (!%p1160_p8), 1, %s1044_s21  }
  0x63   : > { %s692_s19 = sshll.u32 (!%p1160_p8), %s1291_s16, 3  ;;  %s271_s26 = scalar_lea.sflag (!%p1160_p8), [#allocation5], %s1291_s16 }
  0x64   : > { %s1297_s10 = scalar_lea.vmem (!%p1160_p8), [#allocation4], %s692_s19  ;;  %p1388_p7 = scmp.ne.s32.totalorder (!%p1160_p8), %s1382_s30, 0 }
  0x69   : > { %1027 = dma.done.wait (%p1388_p7), %s271_s26, 128  }
  0x6a   : > { %1029 = vsyncadd (%p1388_p7), %s271_s26, 4294967168  ;;  %p1389_p2 = scmp.ne.s32.totalorder %s1380_s28, 0 }
  0x6c   : > { %1031 = dma.done.wait (%p1389_p2), [#allocation8], 8192  }
  0x6d   : > { %1033 = vsyncadd (%p1389_p2), [#allocation8], 4294959104  ;;  %v1069_v0 = vmov 0.0   ;;  %v334_v1 = vld [vmem:[#allocation7 + $0x8] sm:$0xff]  ;;  %v336_v2 = vld [vmem:[#allocation7 + $0x18] sm:$0xff]  ;;  %s698_s9 = sshll.u32 %s1052_s23, 7 }
  0x6e   : > { %441 = vmatprep.mubr.f32.mxu0 %v1069_v0  ;;  %v333_v3 = vld [vmem:[#allocation7] sm:$0xff]  ;;  %v736_v4 = vpack.c.bf16 %v336_v2, %v334_v1  ;;  %v335_v5 = vld [vmem:[#allocation7 + $0x10] sm:$0xff]  ;;  %v338_v6 = vld [vmem:[#allocation7 + $0x28] sm:$0xff]  ;;  %s312_s12 = scalar_lea.vmem [#allocation10], %s692_s19  ;;  %s1320_s11 = scalar_lea.hbm %s1375_s6, %s698_s9 }
  0x6f   : > { %v340_v7 = vld [vmem:[#allocation7 + $0x38] sm:$0xff]  ;;  %v738_v8 = vpack.c.bf16 %v335_v5, %v333_v3  ;;  %v337_v10 = vld [vmem:[#allocation7 + $0x20] sm:$0xff]  ;;  %v339_v11 = vld [vmem:[#allocation7 + $0x30] sm:$0xff]  ;;  %s569_s14 = sshll.u32 %s312_s12, 4  ;;  %s556_s13 = scalar_lea.sflag [#allocation6], %s1291_s16  ;;  %s1322_s14 = int_to_ptr.vmem [resolvable:$true] %s569_s14 }
  0x70   : > { %v740_v9 = vpack.c.bf16 %v340_v7, %v338_v6  ;;  %v342_v12 = vld [vmem:[#allocation7 + $0x48] sm:$0xff]  ;;  %737 = vmatprep.subr.bf16.mxu0 %v736_v4  ;;  %v344_v13 = vld [vmem:[#allocation7 + $0x58] sm:$0xff]  ;;  %v742_v14 = vpack.c.bf16 %v339_v11, %v337_v10  ;;  %v341_v16 = vld [vmem:[#allocation7 + $0x40] sm:$0xff]  ;;  %s974_s26 = scalar_lea.vmem %s1322_s14, 128  ;;  %p1390_p12 = scmp.ne.s32.totalorder %s1386_s17, 0 }
  0x71   : > { %739 = vmatpush1.bf16.msra.mxu0 %v738_v8  ;;  %v744_v15 = vpack.c.bf16 %v344_v13, %v342_v12  ;;  %v343_v17 = vld [vmem:[#allocation7 + $0x50] sm:$0xff]  ;;  %v346_v18 = vld [vmem:[#allocation7 + $0x68] sm:$0xff]  ;;  %v348_v19 = vld [vmem:[#allocation7 + $0x78] sm:$0xff]  ;;  %p975_p8 = scmp.ne.s32.totalorder %s1322_s14, %s974_s26  ;;  %s1070_s23 = smov [#allocation10]  }
  0x72   : > { %741 = vmatprep.subr.bf16.mxu0 %v740_v9  ;;  %v746_v20 = vpack.c.bf16 %v343_v17, %v341_v16  ;;  %v748_v21 = vpack.c.bf16 %v348_v19, %v346_v18  ;;  %v345_v22 = vld [vmem:[#allocation7 + $0x60] sm:$0xff]  ;;  %v347_v23 = vld [vmem:[#allocation7 + $0x70] sm:$0xff]  ;;  %v350_v24 = vld [vmem:[#allocation7 + $0x88] sm:$0xff]  ;;  %s978_s19 = sshll.u32 %s1070_s23, 4  ;;  %s979_s19 = int_to_ptr.vmem [resolvable:$false] %s978_s19 }
  0x73   : > { %v352_v25 = vld [vmem:[#allocation7 + $0x98] sm:$0xff]  ;;  %v349_v26 = vld [vmem:[#allocation7 + $0x80] sm:$0xff]  ;;  %v351_v27 = vld [vmem:[#allocation7 + $0x90] sm:$0xff]  ;;  %v750_v31 = vpack.c.bf16 %v347_v23, %v345_v22  ;;  %p976_p1 = pnand %p975_p8, %p1390_p12  ;;  %p981_p3 = scmp.lt.s32.totalorder %s1322_s14, %s979_s19 }
  0x74   : > { %v467_v28 = vld [vmem:[#allocation9 + $0x80] sm:$0xff]  ;;  %v468_v29 = vld [vmem:[#allocation9 + $0x88] sm:$0xff]  ;;  %v469_v34 = vld [vmem:[#allocation9 + $0x90] sm:$0xff]  ;;  %v752_v36 = vpack.c.bf16 %v352_v25, %v350_v24  ;;  %v754_v46 = vpack.c.bf16 %v351_v27, %v349_v26 }
  0x75   : > { %743 = vmatpush1.bf16.msra.mxu0 %v742_v14  ;;  %v451_v30 = vld [vmem:[#allocation9] sm:$0xff]  ;;  %v768_v32 = vpack.c.bf16 %v468_v29, %v467_v28  ;;  %v452_v33 = vld [vmem:[#allocation9 + $0x8] sm:$0xff]  ;;  %v470_v35 = vld [vmem:[#allocation9 + $0x98] sm:$0xff]  ;;  %p977_p10 = pneg %p976_p1 }
  0x76   : > { %745 = vmatprep.subr.bf16.mxu0 %v744_v15  ;;  %v770_v37 = vpack.c.bf16 %v452_v33, %v451_v30  ;;  %v772_v38 = vpack.c.bf16 %v470_v35, %v469_v34  ;;  %v453_v39 = vld [vmem:[#allocation9 + $0x10] sm:$0xff]  ;;  %v454_v40 = vld [vmem:[#allocation9 + $0x18] sm:$0xff]  ;;  %v471_v41 = vld [vmem:[#allocation9 + $0xa0] sm:$0xff]  ;;  %v367_v34 = vlaneseq }
  0x77   : > { %v354_v42 = vld [vmem:[#allocation7 + $0xa8] sm:$0xff]  ;;  %v356_v43 = vld [vmem:[#allocation7 + $0xb8] sm:$0xff]  ;;  %769 = vmatprep.subr.bf16.mxu1 %v768_v32  ;;  %v774_v45 = vpack.c.bf16 %v454_v40, %v453_v39  ;;  %v353_v47 = vld [vmem:[#allocation7 + $0xa0] sm:$0xff] }
  0x78   : > { %v472_v44 = vld [vmem:[#allocation9 + $0xa8] sm:$0xff]  ;;  %771 = vmatpush3.bf16.msra.mxu1 %v770_v37  ;;  %v455_v49 = vld [vmem:[#allocation9 + $0x20] sm:$0xff]  ;;  %v756_v51 = vpack.c.bf16 %v356_v43, %v354_v42  ;;  %v355_v52 = vld [vmem:[#allocation7 + $0xb0] sm:$0xff]  ;;  %v368_v35 = vshrl.u32 %v367_v34, 7 }
  0x79   : > { %747 = vmatpush1.bf16.msra.mxu0 %v746_v20  ;;  %773 = vmatprep.subr.bf16.mxu1 %v772_v38  ;;  %v776_v48 = vpack.c.bf16 %v472_v44, %v471_v41  ;;  %v456_v50 = vld [vmem:[#allocation9 + $0x28] sm:$0xff]  ;;  %v473_v53 = vld [vmem:[#allocation9 + $0xb0] sm:$0xff]  ;;  %v474_v54 = vld [vmem:[#allocation9 + $0xb8] sm:$0xff]  ;;  %v758_v58 = vpack.c.bf16 %v355_v52, %v353_v47 }
  0x7a   : > { %749 = vmatprep.subr.bf16.mxu0 %v748_v21  ;;  %v358_v55 = vld [vmem:[#allocation7 + $0xc8] sm:$0xff]  ;;  %v360_v56 = vld [vmem:[#allocation7 + $0xd8] sm:$0xff]  ;;  %v778_v57 = vpack.c.bf16 %v456_v50, %v455_v49  ;;  %v357_v59 = vld [vmem:[#allocation7 + $0xc0] sm:$0xff]  ;;  %v780_v60 = vpack.c.bf16 %v474_v54, %v473_v53  ;;  %v373_v38 = vsub.s32 1, %v368_v35 }
  0x7b   : > { %v457_v61 = vld [vmem:[#allocation9 + $0x30] sm:$0xff]  ;;  %v458_v62 = vld [vmem:[#allocation9 + $0x38] sm:$0xff]  ;;  %v760_v63 = vpack.c.bf16 %v360_v56, %v358_v55  ;;  %v475_v1 = vld [vmem:[#allocation9 + $0xc0] sm:$0xff] }
  0x7c   : > { %775 = vmatpush3.bf16.msra.mxu1 %v774_v45  ;;  %v359_v0 = vld [vmem:[#allocation7 + $0xd0] sm:$0xff]  ;;  %v476_v2 = vld [vmem:[#allocation9 + $0xc8] sm:$0xff]  ;;  %v364_v4 = vld [vmem:[#allocation7 + $0xf8] sm:$0xff]  ;;  %v782_v5 = vpack.c.bf16 %v458_v62, %v457_v61 }
  0x7d   : > { %751 = vmatpush1.bf16.msra.mxu0 %v750_v31  ;;  %777 = vmatprep.subr.bf16.mxu1 %v776_v48  ;;  %v362_v3 = vld [vmem:[#allocation7 + $0xe8] sm:$0xff]  ;;  %v762_v6 = vpack.c.bf16 %v359_v0, %v357_v59  ;;  %v361_v7 = vld [vmem:[#allocation7 + $0xe0] sm:$0xff]  ;;  %v784_v8 = vpack.c.bf16 %v476_v2, %v475_v1  ;;  %v363_v12 = vld [vmem:[#allocation7 + $0xf0] sm:$0xff] }
  0x7e   : > { %753 = vmatprep.subr.bf16.mxu0 %v752_v36  ;;  %v459_v9 = vld [vmem:[#allocation9 + $0x40] sm:$0xff]  ;;  %v460_v10 = vld [vmem:[#allocation9 + $0x48] sm:$0xff]  ;;  %v764_v11 = vpack.c.bf16 %v364_v4, %v362_v3  ;;  %v477_v13 = vld [vmem:[#allocation9 + $0xd0] sm:$0xff]  ;;  %v766_v16 = vpack.c.bf16 %v363_v12, %v361_v7  ;;  %v369_v36 = vsub.s32 0, %v368_v35 }
  0x7f   : > { %v478_v14 = vld [vmem:[#allocation9 + $0xd8] sm:$0xff]  ;;  %v786_v15 = vpack.c.bf16 %v460_v10, %v459_v9  ;;  %v461_v18 = vld [vmem:[#allocation9 + $0x50] sm:$0xff]  ;;  %v479_v20 = vld [vmem:[#allocation9 + $0xe0] sm:$0xff] }
  0x80   : > { %779 = vmatpush3.bf16.msra.mxu1 %v778_v57  ;;  %v788_v17 = vpack.c.bf16 %v478_v14, %v477_v13  ;;  %v462_v19 = vld [vmem:[#allocation9 + $0x58] sm:$0xff]  ;;  %v480_v21 = vld [vmem:[#allocation9 + $0xe8] sm:$0xff]  ;;  %v463_v25 = vld [vmem:[#allocation9 + $0x60] sm:$0xff] }
  0x81   : > { %755 = vmatpush1.bf16.msra.mxu0 %v754_v46  ;;  %781 = vmatprep.subr.bf16.mxu1 %v780_v60  ;;  %v790_v22 = vpack.c.bf16 %v462_v19, %v461_v18  ;;  %v332_v23 = vld [vmem:[%s1297_s10] sm:$0xff]  ;;  %v792_v24 = vpack.c.bf16 %v480_v21, %v479_v20  ;;  %v464_v26 = vld [vmem:[#allocation9 + $0x68] sm:$0xff]  ;;  %s980_s10 = scalar_lea.vmem %s979_s19, 256 }
  0x82   : > { %757 = vmatprep.subr.bf16.mxu0 %v756_v51  ;;  %v794_v27 = vpack.c.bf16 %v464_v26, %v463_v25  ;;  %v481_v28 = vld [vmem:[#allocation9 + $0xf0] sm:$0xff]  ;;  %v482_v29 = vld [vmem:[#allocation9 + $0xf8] sm:$0xff]  ;;  %p982_p5 = scmp.lt.s32.totalorder %s980_s10, %s974_s26 }
  0x83   : > { %v796_v30 = vpack.c.bf16 %v482_v29, %v481_v28  ;;  %v465_v31 = vld [vmem:[#allocation9 + $0x70] sm:$0xff]  ;;  %v466_v32 = vld [vmem:[#allocation9 + $0x78] sm:$0xff] }
  0x84   : > { %783 = vmatpush3.bf16.msra.mxu1 %v782_v5  ;;  %v798_v33 = vpack.c.bf16 %v466_v32, %v465_v31  ;;  %v365_v37 = vld [vmem:[%s1372_s3] sm:$0x3]  ;;  %p983_p9 = por %p982_p5, %p981_p3 }
  0x85   : > { %759 = vmatpush1.bf16.msra.mxu0 %v758_v58  ;;  %785 = vmatprep.subr.bf16.mxu1 %v784_v8  ;;  %v370_v39 = vrot.slane %v365_v37, %v369_v36  ;;  %v374_v40 = vrot.slane %v365_v37, %v373_v38  ;;  %v696_v48 = vld [vmem:[%s1374_s5] ss:$0 sm:$0xff] }
  0x86   : > { %761 = vmatprep.subr.bf16.mxu0 %v760_v63  ;;  %p984_p11 = pnand %p983_p9, %p977_p10 }
  0x88   : > { %787 = vmatpush3.bf16.msra.mxu1 %v786_v15 }
  0x89   : > { %763 = vmatpush1.bf16.msra.mxu0 %v762_v6  ;;  %789 = vmatprep.subr.bf16.mxu1 %v788_v17 }
  0x8a   : > { %765 = vmatprep.subr.bf16.mxu0 %v764_v11 }
  0x8c   : > { %791 = vmatpush3.bf16.msra.mxu1 %v790_v22 }
  0x8d   : > { %767 = vmatpush1.bf16.msra.mxu0 %v766_v16  ;;  %793 = vmatprep.subr.bf16.mxu1 %v792_v24 }
  0x90   : > { %442 = vmatmul.mubr.f32.vlgmr.msra.gmra.mrb[0].mxu0 %v332_v23  ;;  %795 = vmatpush3.bf16.msra.mxu1 %v794_v27 }
  0x91   : > { %797 = vmatprep.subr.bf16.mxu1 %v796_v30 }
  0x94   : > { %799 = vmatpush3.bf16.msra.mxu1 %v798_v33 }
 0x163   : > { %v443_v41 = vpop.f32.mrb[0].mxu0 }
 0x164   : > { %v444_v42 = vadd.f32 %v443_v41, %v370_v39  ;;  %v445_v43 = vpop.f32.mrb[1].mxu0 }
 0x165   : > { %v446_v44 = vadd.f32 %v445_v43, %v374_v40 }
 0x166   : > { %v448_v46 = vmax.f32 %v444_v42, 0.0 }
 0x167   : > { %v449_v45 = vmax.f32 %v446_v44, 0.0 }
 0x169   : > { %547 = vmatprep.mubr.f32.mxu1 %v449_v45 }
 0x16a   : > { %548 = vmatmul.mubr.f32.vlgmr.msra.gmra.mrb[0].mxu1 %v448_v46 }
 0x23d   : > { %v733_v47 = vpop.f32.mrb[0].mxu1 }
 0x23e   : > { %v734_v49 = vpop.f32.mrb[1].mxu1 }
 0x23f   : > { %v735_v50 = vadd.f32 %v734_v49, %v733_v47 }
 0x241   : > { %v553_v51 = vadd.f32 %v735_v50, %v696_v48 }
 0x243   : > { %554 = vst [vmem:[%s312_s12] sm:$0xff] %v553_v51 }
 0x244   : > { %987 = shalt.err (!%p984_p11)
}
 0x245   : > { %s988_s16 = scalar_lea.hbm %s1320_s11, 128  ;;  %s992_s8 = scalar_lea.hbm %s1375_s6, 256 }
 0x246   : > { %p989_p0 = scmp.ne.s32.totalorder %s1320_s11, %s988_s16  ;;  %p993_p6 = scmp.lt.u32.totalorder %s1320_s11, %s1375_s6 }
 0x247   : > { %p994_p7 = scmp.lt.u32.totalorder %s992_s8, %s988_s16  ;;  %p996_p8 = scmp.lt.u32.totalorder %s988_s16, %s1320_s11 }
 0x248   : > { %p990_p4 = pnand %p989_p0, %p1390_p12 }
 0x249   : > { %p995_p2 = por %p994_p7, %p993_p6 }
 0x24a   : > { %p991_p13 = pneg %p990_p4 }
 0x24b   : > { %p997_p1 = por %p996_p8, %p995_p2 }
 0x24d   : > { %p998_p10 = pnand %p997_p1, %p991_p13 }
 0x24f   : > { %1001 = shalt.err (!%p998_p10)
}
 0x250   : > { %810 = dma.vmem_to_hbm [thread:$0]  (%p1390_p12), %s1322_s14, 128, %s1320_s11, %s556_s13  }
 0x251 PF: > { %s581_s12 = sand.u32 1, %s1040_s0   ;;  %p1391_p3 = scmp.ne.s32.totalorder %s1383_s7, 0 }
 0x252   : > { %p1392_p5 = scmp.ge.s32.totalorder %s1060_s25, 2  ;;  %s582_s18 = scalar_lea.sflag [#allocation6], %s581_s12 }
 0x254   : > { %p824_p9 = pnand %p1392_p5, %p1391_p3 }
 0x256   : > { %1035 = dma.done.wait (!%p824_p9), %s582_s18, 128  }
 0x257   : > { %1037 = vsyncadd (!%p824_p9), %s582_s18, 4294967168  ;;  %s24_s25 = sadd.s32 1, %s1060_s25   ;;  %s1393_s0 = smov %s1044_s21 }
 0x258   : > { %p21_p11 = scmp.ge.s32.totalorder %s24_s25, 4   ;;  %s1394_s21 = smov %s1048_s22 }
 0x259   : > { %s1395_s22 = smov %s1248_s20  ;;  %s1396_s23 = smov %s1056_s24 }
 0x25a   : > { %s1397_s24 = smov %s1399_s15  ;;  %23 = sbr.rel (!%p21_p11) target bundleno = 7 (0x7), region = 102 }
 0x261   :  { %587 = vsyncpa [#allocation5], 1 }
 0x262   :  { %589 = vsyncpa [#allocation5 + $0x1], 1 }
 0x263   :  { %590 = vsyncpa [#allocation8], 1 }
 0x264   :  { %591 = vsyncpa [#allocation6], 1 }
 0x265   :  { %593 = vsyncpa [#allocation6 + $0x1], 1 }

</bundles_post_ra>
